<compile_context>
chip_gen: v7x
topology: tpu7x:2x2x1
jax: 0.10.0
libtpu: 0.0.40
codegen_flags: <defaults>
</compile_context>

<pallas_src>
import functools

import jax
import jax.numpy as jnp
from jax.experimental import pallas as pl
from jax.experimental.pallas import tpu as pltpu

N_CLASSES = 10
N_PAD = 128          # lane-dense output width
LANE = 128
SUBLANE = 8
MAX_TB = 512         # batch tile cap; (512, 896) bf16 ~= 0.9 MiB per buffer


def _round_up(x, m):
    return ((x + m - 1) // m) * m


def _linear_kernel(x_ref, w_ref, b_ref, o_ref):
    # x_ref: (TB, Kp) bf16   w_ref: (Kp, N_PAD) bf16
    # b_ref: (1, N_PAD) f32  o_ref: (TB, N_PAD) f32
    acc = jnp.dot(x_ref[...], w_ref[...], preferred_element_type=jnp.float32)
    o_ref[...] = acc + b_ref[...]


@functools.partial(jax.jit, static_argnames=())
def linear_layer_forward(x_nchw, w_t, b):
    """Pallas forward: flatten NCHW input and apply the single linear layer.

    x_nchw : (B, C, H, W) float32
    w_t    : (K, 10) float32  -- transposed nn.Linear weight (K = C*H*W)
    b      : (10,)   float32
    returns: (B, 10) float32 logits
    """
    B = x_nchw.shape[0]
    K = w_t.shape[0]
    n_cls = w_t.shape[1]

    # ---- wrapper-side layout plumbing (plain JAX, outside the kernel) ----
    Kp = _round_up(K, LANE)                       # 784 -> 896
    TB = min(MAX_TB, _round_up(B, SUBLANE))       # batch tile (multiple of 8)
    Bp = _round_up(B, TB)                         # padded batch for even grid

    x2d = x_nchw.reshape(B, K)                    # x.view(B, -1)
    x_pad = jnp.zeros((Bp, Kp), dtype=jnp.bfloat16)
    x_pad = x_pad.at[:B, :K].set(x2d.astype(jnp.bfloat16))

    w_pad = jnp.zeros((Kp, N_PAD), dtype=jnp.bfloat16)
    w_pad = w_pad.at[:K, :n_cls].set(w_t.astype(jnp.bfloat16))

    b_pad = jnp.zeros((1, N_PAD), dtype=jnp.float32)
    b_pad = b_pad.at[0, :n_cls].set(b)

    grid = (Bp // TB,)

    cost = pl.CostEstimate(
        flops=2 * Bp * Kp * N_PAD,
        transcendentals=0,
        bytes_accessed=Bp * Kp * 2 + Kp * N_PAD * 2 + Bp * N_PAD * 4,
    )

    out_pad = pl.pallas_call(
        _linear_kernel,
        out_shape=jax.ShapeDtypeStruct((Bp, N_PAD), jnp.float32),
        grid=grid,
        in_specs=[
            pl.BlockSpec((TB, Kp), lambda i: (i, 0)),     # streamed batch tile
            pl.BlockSpec((Kp, N_PAD), lambda i: (0, 0)),  # resident weight
            pl.BlockSpec((1, N_PAD), lambda i: (0, 0)),   # resident bias
        ],
        out_specs=pl.BlockSpec((TB, N_PAD), lambda i: (i, 0)),
        compiler_params=pltpu.CompilerParams(
            dimension_semantics=("parallel",),
        ),
        cost_estimate=cost,
    )(x_pad, w_pad, b_pad)

    return out_pad[:B, :n_cls]


def init_params(key, input_=784, num_classes=10):
    """Deterministic params matching _weights_init:
       xavier_uniform_ on weight, bias filled with 0."""
    fan_in, fan_out = input_, num_classes
    bound = jnp.sqrt(6.0 / (fan_in + fan_out))
    # PyTorch weight shape is (out, in) = (10, input_); store transpose (K, N).
    w = jax.random.uniform(
        key, (num_classes, input_), minval=-bound, maxval=bound, dtype=jnp.float32
    )
    w_t = w.T                                   # (K, 10)
    b = jnp.zeros((num_classes,), dtype=jnp.float32)
    return w_t, b


if __name__ == "__main__":
    key = jax.random.PRNGKey(0)
    k_x, k_w = jax.random.split(key)

    # Small MNIST-like input consistent with input_=784: (B=2, C=1, H=28, W=28)
    B, C, H, W = 2, 1, 28, 28
    input_ = C * H * W  # 784
    x = jax.random.normal(k_x, (B, C, H, W), dtype=jnp.float32)

    w_t, b = init_params(k_w, input_=input_, num_classes=N_CLASSES)

    logits = linear_layer_forward(x, w_t, b)
    logits = jax.block_until_ready(logits)

    # Reference in plain JAX on the same bf16-rounded inputs (f32 accumulate),
    # mirroring the kernel's bf16-input / f32-accumulate MXU math.
    xb = x.reshape(B, -1).astype(jnp.bfloat16).astype(jnp.float32)
    wb = w_t.astype(jnp.bfloat16).astype(jnp.float32)
    ref = xb @ wb + b[None, :]

    assert logits.shape == (B, N_CLASSES)
    assert jnp.allclose(logits, ref, atol=1e-2, rtol=1e-2)

    print("KERNEL_OK")
</pallas_src>

<mosaic_0001>
module attributes {stable_mosaic.version = 11 : i64} {
  func.func @_linear_kernel(%arg0: i32, %arg1: memref<8x896xbf16, #tpu.memory_space<vmem>>, %arg2: memref<896x128xbf16, #tpu.memory_space<vmem>>, %arg3: memref<1x128xf32, #tpu.memory_space<vmem>>, %arg4: memref<8x128xf32, #tpu.memory_space<vmem>>) attributes {dimension_semantics = [#tpu.dimension_semantics<parallel>], iteration_bounds = array<i64: 1>, scalar_prefetch = 0 : i64, scratch_operands = 0 : i64, tpu.core_type = #tpu.core_type<tc>, window_params = [{transform_indices = @transform_0, window_bounds = array<i64: 8, 896>}, {pipeline_mode = #tpu.pipeline_mode<synchronous>, transform_indices = @transform_1, window_bounds = array<i64: 896, 128>}, {pipeline_mode = #tpu.pipeline_mode<synchronous>, transform_indices = @transform_2, window_bounds = array<i64: 1, 128>}, {transform_indices = @transform_3, window_bounds = array<i64: 8, 128>}]} {
    %c0 = arith.constant 0 : index
    %c0_0 = arith.constant 0 : index
    %0 = vector.load %arg1[%c0, %c0_0] : memref<8x896xbf16, #tpu.memory_space<vmem>>, vector<8x896xbf16>
    %c0_1 = arith.constant 0 : index
    %c0_2 = arith.constant 0 : index
    %1 = vector.load %arg2[%c0_1, %c0_2] : memref<896x128xbf16, #tpu.memory_space<vmem>>, vector<896x128xbf16>
    %cst = arith.constant dense<0.000000e+00> : vector<8x128xf32>
    %2 = tpu.matmul %0, %1, %cst {dimension_numbers = #tpu.dot_dimension_numbers<[1], [0], [0], [1], [0, 0, 1, 1], [], []>} : vector<8x896xbf16>, vector<896x128xbf16>, vector<8x128xf32> -> vector<8x128xf32>
    %c0_3 = arith.constant 0 : index
    %c0_4 = arith.constant 0 : index
    %3 = vector.load %arg3[%c0_3, %c0_4] : memref<1x128xf32, #tpu.memory_space<vmem>>, vector<1x128xf32>
    %4 = vector.broadcast %3 : vector<1x128xf32> to vector<8x128xf32>
    %5 = arith.addf %2, %4 : vector<8x128xf32>
    %c0_5 = arith.constant 0 : index
    %c0_6 = arith.constant 0 : index
    %6 = vector.load %arg4[%c0_5, %c0_6] : memref<8x128xf32, #tpu.memory_space<vmem>>, vector<8x128xf32>
    tpu.vector_store %arg4[%c0_5, %c0_6], %5 {strides = array<i32>} : memref<8x128xf32, #tpu.memory_space<vmem>>, vector<8x128xf32>,
    return
  }
  func.func @transform_0(%arg0: i32) -> (i32, i32) {
    %c0_i32 = arith.constant 0 : i32
    %c0_i32_0 = arith.constant 0 : i32
    return %arg0, %c0_i32 : i32, i32
  }
  func.func @transform_1(%arg0: i32) -> (i32, i32) {
    %c0_i32 = arith.constant 0 : i32
    %c0_i32_0 = arith.constant 0 : i32
    %c0_i32_1 = arith.constant 0 : i32
    return %c0_i32, %c0_i32_0 : i32, i32
  }
  func.func @transform_2(%arg0: i32) -> (i32, i32) {
    %c0_i32 = arith.constant 0 : i32
    %c0_i32_0 = arith.constant 0 : i32
    %c0_i32_1 = arith.constant 0 : i32
    return %c0_i32, %c0_i32_0 : i32, i32
  }
  func.func @transform_3(%arg0: i32) -> (i32, i32) {
    %c0_i32 = arith.constant 0 : i32
    %c0_i32_0 = arith.constant 0 : i32
    return %arg0, %c0_i32 : i32, i32
  }
}

</mosaic_0001>

<bundles_post_ra>
// kernel: linear_layer_forward.1
= control target key start
LH: loop header
LB: loop body
LE: loop exit
PB: predicated region body
PF: predicated region fallthrough
CT: control target
= control target key end

     0   :  { %v888_v42 = vmov 0.0   ;;  %vm889_vm0 = vmmov 0   ;;  %s1096_s1 = inlined_call_operand.vmem [shape: bf16[896,128], index: 1, kind: input, shape index: {}]   ;;  %s1097_s0 = inlined_call_operand.vmem [shape: bf16[8,896], index: 0, kind: input, shape index: {}]   ;;  %s1098_s2 = inlined_call_operand.vmem [shape: f32[1,128], index: 2, kind: input, shape index: {}]   ;;  %s1099_s3 = inlined_call_operand.vmem [shape: f32[8,128], index: 3, kind: output, shape index: {}]  }
   0x1   :  { %v825_v0 = vld [vmem:[%s1096_s1 + $0x40] sm:$0xff]   ;;  %v829_v4 = vld [vmem:[%s1096_s1 + $0x48] sm:$0xff]   ;;  %v833_v8 = vld [vmem:[%s1096_s1 + $0x50] sm:$0xff]  }
   0x2   :  { %v826_v1 = vld [vmem:[%s1096_s1] sm:$0xff]   ;;  %728 = vmatprep.subr.bf16.mxu0 %v825_v0  ;;  %v830_v5 = vld [vmem:[%s1096_s1 + $0x8] sm:$0xff]   ;;  %v834_v9 = vld [vmem:[%s1096_s1 + $0x10] sm:$0xff]  }
   0x3   :  { %v827_v2 = vld [vmem:[%s1096_s1 + $0xc0] sm:$0xff]   ;;  %729 = vmatpush3.bf16.msra.mxu0 %v826_v1  ;;  %v831_v6 = vld [vmem:[%s1096_s1 + $0xc8] sm:$0xff]   ;;  %v835_v10 = vld [vmem:[%s1096_s1 + $0xd0] sm:$0xff]  }
   0x4   :  { %v828_v3 = vld [vmem:[%s1096_s1 + $0x80] sm:$0xff]   ;;  %750 = vmatprep.subr.bf16.mxu1 %v827_v2  ;;  %730 = vmatprep.subr.bf16.mxu0 %v829_v4  ;;  %v832_v7 = vld [vmem:[%s1096_s1 + $0x88] sm:$0xff]   ;;  %v836_v11 = vld [vmem:[%s1096_s1 + $0x90] sm:$0xff]  }
   0x5   :  { %751 = vmatpush3.bf16.msra.mxu1 %v828_v3  ;;  %v837_v12 = vld [vmem:[%s1096_s1 + $0x58] sm:$0xff]   ;;  %v841_v16 = vld [vmem:[%s1096_s1 + $0x60] sm:$0xff]   ;;  %v845_v20 = vld [vmem:[%s1096_s1 + $0x68] sm:$0xff]  }
   0x6   :  { %752 = vmatprep.subr.bf16.mxu1 %v831_v6  ;;  %v838_v13 = vld [vmem:[%s1096_s1 + $0x18] sm:$0xff]   ;;  %v842_v17 = vld [vmem:[%s1096_s1 + $0x20] sm:$0xff]   ;;  %v846_v21 = vld [vmem:[%s1096_s1 + $0x28] sm:$0xff]  }
   0x7   :  { %731 = vmatpush3.bf16.msra.mxu0 %v830_v5  ;;  %v839_v14 = vld [vmem:[%s1096_s1 + $0xd8] sm:$0xff]   ;;  %v843_v18 = vld [vmem:[%s1096_s1 + $0xe0] sm:$0xff]   ;;  %v847_v22 = vld [vmem:[%s1096_s1 + $0xe8] sm:$0xff]  }
   0x8   :  { %732 = vmatprep.subr.bf16.mxu0 %v833_v8  ;;  %v840_v15 = vld [vmem:[%s1096_s1 + $0x98] sm:$0xff]   ;;  %v844_v19 = vld [vmem:[%s1096_s1 + $0xa0] sm:$0xff]   ;;  %v848_v23 = vld [vmem:[%s1096_s1 + $0xa8] sm:$0xff]  }
   0x9   :  { %753 = vmatpush3.bf16.msra.mxu1 %v832_v7  ;;  %v849_v24 = vld [vmem:[%s1096_s1 + $0x70] sm:$0xff]   ;;  %v853_v28 = vld [vmem:[%s1096_s1 + $0x78] sm:$0xff]   ;;  %v15_v31 = vld [vmem:[%s1097_s0] sm:$0xff] }
   0xa   :  { %754 = vmatprep.subr.bf16.mxu1 %v835_v10  ;;  %v850_v25 = vld [vmem:[%s1096_s1 + $0x30] sm:$0xff]   ;;  %v854_v29 = vld [vmem:[%s1096_s1 + $0x38] sm:$0xff]   ;;  %v665_v32 = vcombine.low %v15_v31, %v15_v31  ;;  %v666_v33 = vcombine.high %v15_v31, %v15_v31  ;;  %v859_v35 = vld [vmem:[%s1096_s1 + $0x140] sm:$0xff]  }
   0xb   :  { %733 = vmatpush3.bf16.msra.mxu0 %v834_v9  ;;  %v851_v26 = vld [vmem:[%s1096_s1 + $0xf0] sm:$0xff]   ;;  %v855_v30 = vld [vmem:[%s1096_s1 + $0xf8] sm:$0xff]   ;;  %v16_v36 = vld [vmem:[%s1097_s0 + $0x8] sm:$0xff] }
   0xc   :  { %734 = vmatprep.subr.bf16.mxu0 %v837_v12  ;;  %v852_v27 = vld [vmem:[%s1096_s1 + $0xb0] sm:$0xff]   ;;  %v858_v34 = vld [vmem:[%s1096_s1 + $0xb8] sm:$0xff]   ;;  %531 = vmatprep.mubr.bf16.mxu0 %v666_v33  ;;  %v667_v37 = vcombine.low %v16_v36, %v16_v36  ;;  %v668_v38 = vcombine.high %v16_v36, %v16_v36  ;;  %v862_v39 = vld [vmem:[%s1096_s1 + $0x100] sm:$0xff]  }
   0xd   :  { %755 = vmatpush3.bf16.msra.mxu1 %v836_v11  ;;  %v863_v40 = vld [vmem:[%s1096_s1 + $0x180] sm:$0xff]   ;;  %v864_v41 = vld [vmem:[%s1096_s1 + $0x148] sm:$0xff]   ;;  %v867_v45 = vld [vmem:[%s1096_s1 + $0x150] sm:$0xff]  }
   0xe   :  { %756 = vmatprep.subr.bf16.mxu1 %v839_v14  ;;  %571 = vmatprep.mubr.bf16.mxu1 %v668_v38  ;;  %v865_v43 = vld [vmem:[%s1096_s1 + $0x108] sm:$0xff]   ;;  %v868_v46 = vld [vmem:[%s1096_s1 + $0x110] sm:$0xff]   ;;  %v870_v48 = vld [vmem:[%s1096_s1 + $0x158] sm:$0xff]  }
   0xf   :  { %735 = vmatpush3.bf16.msra.mxu0 %v838_v13  ;;  %v866_v44 = vld [vmem:[%s1096_s1 + $0x188] sm:$0xff]   ;;  %v869_v47 = vld [vmem:[%s1096_s1 + $0x190] sm:$0xff]   ;;  %v871_v49 = vld [vmem:[%s1096_s1 + $0x118] sm:$0xff]  }
  0x10   :  { %736 = vmatprep.subr.bf16.mxu0 %v841_v16  ;;  %v873_v50 = vld [vmem:[%s1096_s1 + $0x160] sm:$0xff]   ;;  %v872_v51 = vld [vmem:[%s1096_s1 + $0x198] sm:$0xff]   ;;  %v876_v53 = vld [vmem:[%s1096_s1 + $0x168] sm:$0xff]  }
  0x11   :  { %757 = vmatpush3.bf16.msra.mxu1 %v840_v15  ;;  %v874_v52 = vld [vmem:[%s1096_s1 + $0x120] sm:$0xff]   ;;  %v877_v55 = vld [vmem:[%s1096_s1 + $0x128] sm:$0xff]   ;;  %v879_v56 = vld [vmem:[%s1096_s1 + $0x170] sm:$0xff]  }
  0x12   :  { %758 = vmatprep.subr.bf16.mxu1 %v843_v18  ;;  %v875_v54 = vld [vmem:[%s1096_s1 + $0x1a0] sm:$0xff]   ;;  %v878_v57 = vld [vmem:[%s1096_s1 + $0x1a8] sm:$0xff]   ;;  %v17_v58 = vld [vmem:[%s1097_s0 + $0x10] sm:$0xff] }
  0x13   :  { %737 = vmatpush3.bf16.msra.mxu0 %v842_v17  ;;  %v880_v59 = vld [vmem:[%s1096_s1 + $0x130] sm:$0xff]   ;;  %v670_v60 = vcombine.high %v17_v58, %v17_v58  ;;  %v882_v61 = vld [vmem:[%s1096_s1 + $0x178] sm:$0xff]   ;;  %v669_v1 = vcombine.low %v17_v58, %v17_v58  ;;  %v664_v4 = vld [vmem:[%s1098_s2] ss:$0 sm:$0xff] }
  0x14   :  { %738 = vmatprep.subr.bf16.mxu0 %v845_v20  ;;  %v881_v62 = vld [vmem:[%s1096_s1 + $0x1b0] sm:$0xff]   ;;  %v883_v63 = vld [vmem:[%s1096_s1 + $0x138] sm:$0xff]  }
  0x15   :  { %759 = vmatpush3.bf16.msra.mxu1 %v844_v19  ;;  %v886_v0 = vld [vmem:[%s1096_s1 + $0x1b8] sm:$0xff]  }
  0x16   :  { %760 = vmatprep.subr.bf16.mxu1 %v847_v22  ;;  %v887_v2 = vld [vmem:[%s1097_s0 + $0x18] ss:$0 sps:$4 sm:$0xff]  }
  0x17   :  { %739 = vmatpush3.bf16.msra.mxu0 %v846_v21 }
  0x18   :  { %740 = vmatprep.subr.bf16.mxu0 %v849_v24 }
  0x19   :  { %761 = vmatpush3.bf16.msra.mxu1 %v848_v23 }
  0x1a   :  { %762 = vmatprep.subr.bf16.mxu1 %v851_v26 }
  0x1b   :  { %741 = vmatpush3.bf16.msra.mxu0 %v850_v25 }
  0x1c   :  { %742 = vmatprep.subr.bf16.mxu0 %v853_v28 }
  0x1d   :  { %763 = vmatpush3.bf16.msra.mxu1 %v852_v27 }
  0x1e   :  { %764 = vmatprep.subr.bf16.mxu1 %v855_v30 }
  0x1f   :  { %743 = vmatpush3.bf16.msra.mxu0 %v854_v29 }
  0x20   :  { %772 = vmatprep.subr.bf16.mxu0 %v859_v35 }
  0x21   :  { %765 = vmatpush3.bf16.msra.mxu1 %v858_v34 }
  0x22   :  { %532 = vmatmul.mubr.bf16.vlgmr.msra.gmra.mrb[0].mxu0 %v665_v32  ;;  %803 = vmatprep.subr.bf16.mxu1 %v888_v42 }
  0x23   :  { %773 = vmatpush3.bf16.msra.mxu0 %v862_v39  ;;  %611 = vmatprep.mubr.bf16.mxu0 %v670_v60 }
  0x24   :  { %572 = vmatmul.mubr.bf16.vlgmr.msra.gmra.mrb[0].mxu1 %v667_v37  ;;  %774 = vmatprep.subr.bf16.mxu0 %v864_v41 }
  0x25   :  { %804 = vmatpush3.bf16.msra.mxu1 %v863_v40  ;;  %819 = vmatprep.mubr.msk.bf16.mxu1 %vm889_vm0, %v888_v42 }
  0x26   :  { %805 = vmatprep.subr.bf16.mxu1 %v888_v42 }
  0x27   :  { %775 = vmatpush3.bf16.msra.mxu0 %v865_v43 }
  0x28   :  { %776 = vmatprep.subr.bf16.mxu0 %v867_v45 }
  0x29   :  { %806 = vmatpush3.bf16.msra.mxu1 %v866_v44 }
  0x2a   :  { %807 = vmatprep.subr.bf16.mxu1 %v888_v42 }
  0x2b   :  { %777 = vmatpush3.bf16.msra.mxu0 %v868_v46 }
  0x2c   :  { %778 = vmatprep.subr.bf16.mxu0 %v870_v48 }
  0x2d   :  { %808 = vmatpush3.bf16.msra.mxu1 %v869_v47 }
  0x2e   :  { %809 = vmatprep.subr.bf16.mxu1 %v888_v42 }
  0x2f   :  { %779 = vmatpush3.bf16.msra.mxu0 %v871_v49 }
  0x30   :  { %780 = vmatprep.subr.bf16.mxu0 %v873_v50 }
  0x31   :  { %810 = vmatpush3.bf16.msra.mxu1 %v872_v51 }
  0x32   :  { %811 = vmatprep.subr.bf16.mxu1 %v888_v42 }
  0x33   :  { %781 = vmatpush3.bf16.msra.mxu0 %v874_v52 }
  0x34   :  { %782 = vmatprep.subr.bf16.mxu0 %v876_v53 }
  0x35   :  { %812 = vmatpush3.bf16.msra.mxu1 %v875_v54 }
  0x36   :  { %813 = vmatprep.subr.bf16.mxu1 %v888_v42 }
  0x37   :  { %783 = vmatpush3.bf16.msra.mxu0 %v877_v55 }
  0x38   :  { %784 = vmatprep.subr.bf16.mxu0 %v879_v56 }
  0x39   :  { %814 = vmatpush3.bf16.msra.mxu1 %v878_v57 }
  0x3a   :  { %815 = vmatprep.subr.bf16.mxu1 %v888_v42 }
  0x3b   :  { %785 = vmatpush3.bf16.msra.mxu0 %v880_v59 }
  0x3c   :  { %786 = vmatprep.subr.bf16.mxu0 %v882_v61 }
  0x3d   :  { %816 = vmatpush3.bf16.msra.mxu1 %v881_v62 }
  0x3e   :  { %817 = vmatprep.subr.bf16.mxu1 %v888_v42 }
  0x3f   :  { %787 = vmatpush3.bf16.msra.mxu0 %v883_v63 }
  0x41   :  { %818 = vmatpush3.bf16.msra.mxu1 %v886_v0 }
  0x42   :  { %612 = vmatmul.mubr.bf16.vlgmr.msra.gmra.mrb[4].mxu0 %v669_v1 }
  0x44   :  { %820 = vmatmul.mubr.bf16.vlgmr.msra.gmra.mrb[4].mxu1 %v887_v2 }
  0xf5   :  { %v744_v3 = vpop.f32.mrb[0].mxu0 }
  0xf6   :  { %v745_v5 = vpop.f32.mrb[1].mxu0 }
  0xf7   :  { %v746_v6 = vadd.f32 %v745_v5, %v744_v3  ;;  %v747_v7 = vpop.f32.mrb[2].mxu0  ;;  %v766_v8 = vpop.f32.mrb[0].mxu1 }
  0xf8   :  { %v748_v9 = vpop.f32.mrb[3].mxu0  ;;  %v767_v10 = vpop.f32.mrb[1].mxu1 }
  0xf9   :  { %v534_v11 = vadd.f32 %v746_v6, %v664_v4  ;;  %v768_v12 = vadd.f32 %v767_v10, %v766_v8  ;;  %v769_v13 = vpop.f32.mrb[2].mxu1 }
  0xfa   :  { %v770_v14 = vpop.f32.mrb[3].mxu1 }
  0xfb   :  { %v574_v15 = vadd.f32 %v768_v12, %v534_v11 }
 0x115   :  { %v788_v16 = vpop.f32.mrb[4].mxu0 }
 0x116   :  { %v789_v17 = vpop.f32.mrb[5].mxu0 }
 0x117   :  { %v790_v18 = vadd.f32 %v789_v17, %v788_v16  ;;  %v791_v19 = vpop.f32.mrb[6].mxu0  ;;  %v653_v20 = vpop.f32.mrb[4].mxu1 }
 0x118   :  { %v792_v21 = vpop.f32.mrb[7].mxu0  ;;  %v821_v22 = vpop.f32.mrb[5].mxu1 }
 0x119   :  { %v614_v23 = vadd.f32 %v790_v18, %v574_v15  ;;  %v656_v24 = vpop.f32.mrb[6].mxu1 }
 0x11a   :  { %v822_v25 = vpop.f32.mrb[7].mxu1 }
 0x11b   :  { %v654_v26 = vadd.f32 %v653_v20, %v614_v23 }
 0x11d   :  { %659 = vst [vmem:[%s1099_s3] sm:$0xff] %v654_v26 }

</bundles_post_ra>
